<compile_context>
chip_gen: v7x
topology: tpu7x:2x2x1
jax: 0.10.0
libtpu: 0.0.40
codegen_flags: <defaults>
</compile_context>

<pallas_src>
import functools

import jax
import jax.numpy as jnp
from jax.experimental import pallas as pl
from jax.experimental.pallas import tpu as pltpu


def _round_up(a, b):
    return (a + b - 1) // b * b


def _gru_kernel(x_ref, h_ref, wx_ref, wh_ref, bx_ref, bhn_ref, o_ref):
    """One GRU step for a tile of nodes.

    x_ref:   (TN, Dinp)    padded input tile (matmul dtype, e.g. bf16)
    h_ref:   (TN, Hp)      padded previous hidden tile (full precision, blend)
    wx_ref:  (Dinp, 3*Hp)  W_ih^T, gate columns [r | z | n]
    wh_ref:  (Hp, 3*Hp)    W_hh^T, gate columns [r | z | n]
    bx_ref:  (1, 3*Hp)     [b_ih_r + b_hh_r | b_ih_z + b_hh_z | b_ih_n], f32
    bhn_ref: (1, Hp)       b_hh_n, f32
    o_ref:   (TN, Hp)      new hidden tile
    """
    hp = o_ref.shape[-1]
    h = h_ref[...].astype(jnp.float32)

    # Two small MXU pushes, f32 accumulation; gate columns stay separate so
    # every slice below is lane-aligned (hp is a multiple of 128).
    gx = jnp.dot(x_ref[...], wx_ref[...], preferred_element_type=jnp.float32)
    gx = gx + bx_ref[...]
    gh = jnp.dot(h.astype(wh_ref.dtype), wh_ref[...],
                 preferred_element_type=jnp.float32)

    r = jax.nn.sigmoid(gx[:, 0 * hp:1 * hp] + gh[:, 0 * hp:1 * hp])
    z = jax.nn.sigmoid(gx[:, 1 * hp:2 * hp] + gh[:, 1 * hp:2 * hp])
    n = jnp.tanh(gx[:, 2 * hp:3 * hp] + r * (gh[:, 2 * hp:3 * hp] + bhn_ref[...]))

    # (1 - z) * n + z * h  ==  n + z * (h - n)   (one fewer VPU op)
    o_ref[...] = (n + z * (h - n)).astype(o_ref.dtype)


def prepare_gru_params(w_ih, w_hh, b_ih, b_hh, *, op_dtype=jnp.bfloat16):
    """Fold PyTorch GRU params into lane-aligned transposed weights + biases.

    Call ONCE (outside the per-step forward) -- hoists the transpose / pad /
    cast prologue out of the hot path.

    w_ih: (3*Dh, Din), w_hh: (3*Dh, Dh), b_ih/b_hh: (3*Dh,)  (PyTorch layout).
    Returns (wx (Dinp, 3*Hp), wh (Hp, 3*Hp), bx (1, 3*Hp), bhn (1, Hp), dims).
    """
    three_h, din = w_ih.shape
    dh = w_hh.shape[1]
    assert three_h == 3 * dh and w_hh.shape[0] == 3 * dh

    dinp = _round_up(din, 128)
    hp = _round_up(dh, 128)

    w_ih = w_ih.astype(jnp.float32)
    w_hh = w_hh.astype(jnp.float32)
    b_ih = b_ih.astype(jnp.float32)
    b_hh = b_hh.astype(jnp.float32)

    # Transposed, gate columns [r | z | n], each gate padded to hp lanes.
    wx = jnp.zeros((dinp, 3 * hp), jnp.float32)
    wh = jnp.zeros((hp, 3 * hp), jnp.float32)
    for g in range(3):
        wx = wx.at[:din, g * hp:g * hp + dh].set(w_ih[g * dh:(g + 1) * dh].T)
        wh = wh.at[:dh, g * hp:g * hp + dh].set(w_hh[g * dh:(g + 1) * dh].T)

    # r/z biases pre-summed; b_ih_n lives with gx, b_hh_n applied to gh_n only.
    bx = jnp.zeros((1, 3 * hp), jnp.float32)
    bx = bx.at[0, 0 * hp:0 * hp + dh].set(b_ih[0 * dh:1 * dh] + b_hh[0 * dh:1 * dh])
    bx = bx.at[0, 1 * hp:1 * hp + dh].set(b_ih[1 * dh:2 * dh] + b_hh[1 * dh:2 * dh])
    bx = bx.at[0, 2 * hp:2 * hp + dh].set(b_ih[2 * dh:3 * dh])

    bhn = jnp.zeros((1, hp), jnp.float32)
    bhn = bhn.at[0, :dh].set(b_hh[2 * dh:3 * dh])

    return wx.astype(op_dtype), wh.astype(op_dtype), bx, bhn, (din, dh, dinp, hp)


def gru_forward(x, y, wx, wh, bx, bhn, dims, *, max_node_tile=256,
                op_dtype=jnp.bfloat16):
    """Pallas equivalent of GRU.forward(x, y): x (N, Din), y (N, Dh) -> (N, Dh)."""
    din, dh, dinp, hp = dims
    n = x.shape[0]
    assert x.shape == (n, din) and y.shape == (n, dh)

    # Node tiling: one tile for small N (grid=(1,)); otherwise 256-row tiles
    # (multiple of 16 so bf16 sublane packing is satisfied).
    node_tile = min(max_node_tile, _round_up(n, 16))
    n_pad = _round_up(n, node_tile)

    # Pad to lane-aligned widths.  x is cast to the matmul dtype here (fused
    # with the pad); h stays at full precision -- it is read once and cast to
    # bf16 in-kernel for the MXU, while the residual blend uses the f32 value.
    x_p = jnp.pad(x, ((0, n_pad - n), (0, dinp - din))).astype(op_dtype)
    h_p = jnp.pad(y, ((0, n_pad - n), (0, hp - dh)))

    grid = (n_pad // node_tile,)
    out = pl.pallas_call(
        _gru_kernel,
        out_shape=jax.ShapeDtypeStruct((n_pad, hp), y.dtype),
        grid_spec=pltpu.PrefetchScalarGridSpec(
            num_scalar_prefetch=0,
            grid=grid,
            in_specs=[
                pl.BlockSpec((node_tile, dinp), lambda i: (i, 0)),   # x tile
                pl.BlockSpec((node_tile, hp), lambda i: (i, 0)),     # h tile
                pl.BlockSpec((dinp, 3 * hp), lambda i: (0, 0)),      # W_ih^T (resident)
                pl.BlockSpec((hp, 3 * hp), lambda i: (0, 0)),        # W_hh^T (resident)
                pl.BlockSpec((1, 3 * hp), lambda i: (0, 0)),         # bias (gx)
                pl.BlockSpec((1, hp), lambda i: (0, 0)),             # b_hh_n
            ],
            out_specs=pl.BlockSpec((node_tile, hp), lambda i: (i, 0)),
        ),
        compiler_params=pltpu.CompilerParams(
            dimension_semantics=("parallel",),   # megacore split when grid > 1
            vmem_limit_bytes=32 * 1024 * 1024,
        ),
    )(x_p, h_p, wx, wh, bx, bhn)

    return out[:n, :dh]


def gru_reference(x, y, w_ih, w_hh, b_ih, b_hh, matmul_dtype=jnp.float32):
    """Pure-JAX reference of one PyTorch GRU step.

    matmul_dtype emulates the kernel's matmul-operand rounding (bf16) while
    keeping the residual blend at full precision, like the kernel does.
    """
    f32 = jnp.float32
    mm = lambda a: a.astype(matmul_dtype).astype(f32)
    dh = y.shape[-1]
    gi = mm(x) @ mm(w_ih).T + b_ih.astype(f32)
    gh = mm(y) @ mm(w_hh).T + b_hh.astype(f32)
    r = jax.nn.sigmoid(gi[:, :dh] + gh[:, :dh])
    z = jax.nn.sigmoid(gi[:, dh:2 * dh] + gh[:, dh:2 * dh])
    n = jnp.tanh(gi[:, 2 * dh:] + r * gh[:, 2 * dh:])
    return (1.0 - z) * n + z * y.astype(f32)


if __name__ == "__main__":
    # Small shapes consistent with the module's forward:
    #   N = 16 graph nodes (= GRU "batch"), input_size = Din = 32, hidden = Dh = 32.
    N, Din, Dh = 16, 32, 32

    key = jax.random.PRNGKey(0)
    kx, ky, k1, k2, k3, k4 = jax.random.split(key, 6)

    x = jax.random.normal(kx, (N, Din), dtype=jnp.float32)
    y = jax.random.normal(ky, (N, Dh), dtype=jnp.float32)

    # nn.GRU parameter shapes / init: U(-1/sqrt(Dh), 1/sqrt(Dh)).
    bound = 1.0 / jnp.sqrt(jnp.float32(Dh))
    w_ih = jax.random.uniform(k1, (3 * Dh, Din), jnp.float32, -bound, bound)
    w_hh = jax.random.uniform(k2, (3 * Dh, Dh), jnp.float32, -bound, bound)
    b_ih = jax.random.uniform(k3, (3 * Dh,), jnp.float32, -bound, bound)
    b_hh = jax.random.uniform(k4, (3 * Dh,), jnp.float32, -bound, bound)

    # Parameter packing runs once, outside the per-step forward path.
    wx, wh, bx, bhn, dims = prepare_gru_params(w_ih, w_hh, b_ih, b_hh,
                                               op_dtype=jnp.bfloat16)
    wx, wh, bx, bhn = jax.block_until_ready((wx, wh, bx, bhn))

    fwd = jax.jit(functools.partial(gru_forward, dims=dims))
    out = fwd(x, y, wx, wh, bx, bhn)
    out = jax.block_until_ready(out)

    assert out.shape == (N, Dh)

    # Tight check against a reference with the same bf16 matmul-operand
    # rounding (f32 accumulation), and a sanity check against the pure-f32 math.
    ref_bf16 = gru_reference(x, y, w_ih, w_hh, b_ih, b_hh,
                             matmul_dtype=jnp.bfloat16)
    ref_f32 = gru_reference(x, y, w_ih, w_hh, b_ih, b_hh)
    assert jnp.allclose(out, ref_bf16, atol=1e-4, rtol=1e-4), \
        "Pallas GRU mismatch vs bf16-operand reference"
    assert jnp.allclose(out, ref_f32, atol=2e-2, rtol=2e-2), \
        "Pallas GRU mismatch vs f32 reference"

    print("KERNEL_OK")
</pallas_src>

<mosaic_0001>
module attributes {stable_mosaic.version = 11 : i64} {
  func.func @_gru_kernel(%arg0: i32, %arg1: memref<16x128xbf16, #tpu.memory_space<vmem>>, %arg2: memref<16x128xf32, #tpu.memory_space<vmem>>, %arg3: memref<128x384xbf16, #tpu.memory_space<vmem>>, %arg4: memref<128x384xbf16, #tpu.memory_space<vmem>>, %arg5: memref<1x384xf32, #tpu.memory_space<vmem>>, %arg6: memref<1x128xf32, #tpu.memory_space<vmem>>, %arg7: memref<16x128xf32, #tpu.memory_space<vmem>>) attributes {dimension_semantics = [#tpu.dimension_semantics<parallel>], iteration_bounds = array<i64: 1>, scalar_prefetch = 0 : i64, scratch_operands = 0 : i64, tpu.core_type = #tpu.core_type<tc>, window_params = [{transform_indices = @transform_0, window_bounds = array<i64: 16, 128>}, {transform_indices = @transform_1, window_bounds = array<i64: 16, 128>}, {pipeline_mode = #tpu.pipeline_mode<synchronous>, transform_indices = @transform_2, window_bounds = array<i64: 128, 384>}, {pipeline_mode = #tpu.pipeline_mode<synchronous>, transform_indices = @transform_3, window_bounds = array<i64: 128, 384>}, {pipeline_mode = #tpu.pipeline_mode<synchronous>, transform_indices = @transform_4, window_bounds = array<i64: 1, 384>}, {pipeline_mode = #tpu.pipeline_mode<synchronous>, transform_indices = @transform_5, window_bounds = array<i64: 1, 128>}, {transform_indices = @transform_6, window_bounds = array<i64: 16, 128>}]} {
    %c0 = arith.constant 0 : index
    %c0_0 = arith.constant 0 : index
    %0 = vector.load %arg2[%c0, %c0_0] : memref<16x128xf32, #tpu.memory_space<vmem>>, vector<16x128xf32>
    %c0_1 = arith.constant 0 : index
    %c0_2 = arith.constant 0 : index
    %1 = vector.load %arg1[%c0_1, %c0_2] : memref<16x128xbf16, #tpu.memory_space<vmem>>, vector<16x128xbf16>
    %c0_3 = arith.constant 0 : index
    %c0_4 = arith.constant 0 : index
    %2 = vector.load %arg3[%c0_3, %c0_4] : memref<128x384xbf16, #tpu.memory_space<vmem>>, vector<128x384xbf16>
    %cst = arith.constant dense<0.000000e+00> : vector<16x384xf32>
    %3 = tpu.matmul %1, %2, %cst {dimension_numbers = #tpu.dot_dimension_numbers<[1], [0], [0], [1], [0, 0, 1, 1], [], []>} : vector<16x128xbf16>, vector<128x384xbf16>, vector<16x384xf32> -> vector<16x384xf32>
    %c0_5 = arith.constant 0 : index
    %c0_6 = arith.constant 0 : index
    %4 = vector.load %arg5[%c0_5, %c0_6] : memref<1x384xf32, #tpu.memory_space<vmem>>, vector<1x384xf32>
    %5 = vector.broadcast %4 : vector<1x384xf32> to vector<16x384xf32>
    %6 = arith.addf %3, %5 : vector<16x384xf32>
    %7 = arith.truncf %0 : vector<16x128xf32> to vector<16x128xbf16>
    %c0_7 = arith.constant 0 : index
    %c0_8 = arith.constant 0 : index
    %8 = vector.load %arg4[%c0_7, %c0_8] : memref<128x384xbf16, #tpu.memory_space<vmem>>, vector<128x384xbf16>
    %cst_9 = arith.constant dense<0.000000e+00> : vector<16x384xf32>
    %9 = tpu.matmul %7, %8, %cst_9 {dimension_numbers = #tpu.dot_dimension_numbers<[1], [0], [0], [1], [0, 0, 1, 1], [], []>} : vector<16x128xbf16>, vector<128x384xbf16>, vector<16x384xf32> -> vector<16x384xf32>
    %10 = vector.extract_strided_slice %6 {offsets = [0, 0], sizes = [16, 128], strides = [1, 1]} : vector<16x384xf32> to vector<16x128xf32>
    %11 = vector.extract_strided_slice %9 {offsets = [0, 0], sizes = [16, 128], strides = [1, 1]} : vector<16x384xf32> to vector<16x128xf32>
    %12 = arith.addf %10, %11 : vector<16x128xf32>
    %13 = arith.negf %12 : vector<16x128xf32>
    %14 = math.exp %13 : vector<16x128xf32>
    %cst_10 = arith.constant 1.000000e+00 : f32
    %15 = vector.broadcast %cst_10 : f32 to vector<16x128xf32>
    %16 = arith.addf %15, %14 : vector<16x128xf32>
    %17 = arith.divf %15, %16 : vector<16x128xf32>
    %18 = vector.extract_strided_slice %6 {offsets = [0, 128], sizes = [16, 128], strides = [1, 1]} : vector<16x384xf32> to vector<16x128xf32>
    %19 = vector.extract_strided_slice %9 {offsets = [0, 128], sizes = [16, 128], strides = [1, 1]} : vector<16x384xf32> to vector<16x128xf32>
    %20 = arith.addf %18, %19 : vector<16x128xf32>
    %21 = arith.negf %20 : vector<16x128xf32>
    %22 = math.exp %21 : vector<16x128xf32>
    %cst_11 = arith.constant 1.000000e+00 : f32
    %23 = vector.broadcast %cst_11 : f32 to vector<16x128xf32>
    %24 = arith.addf %23, %22 : vector<16x128xf32>
    %25 = arith.divf %23, %24 : vector<16x128xf32>
    %26 = vector.extract_strided_slice %6 {offsets = [0, 256], sizes = [16, 128], strides = [1, 1]} : vector<16x384xf32> to vector<16x128xf32>
    %27 = vector.extract_strided_slice %9 {offsets = [0, 256], sizes = [16, 128], strides = [1, 1]} : vector<16x384xf32> to vector<16x128xf32>
    %c0_12 = arith.constant 0 : index
    %c0_13 = arith.constant 0 : index
    %28 = vector.load %arg6[%c0_12, %c0_13] : memref<1x128xf32, #tpu.memory_space<vmem>>, vector<1x128xf32>
    %29 = vector.broadcast %28 : vector<1x128xf32> to vector<16x128xf32>
    %30 = arith.addf %27, %29 : vector<16x128xf32>
    %31 = arith.mulf %17, %30 : vector<16x128xf32>
    %32 = arith.addf %26, %31 : vector<16x128xf32>
    %33 = math.tanh %32 : vector<16x128xf32>
    %34 = arith.subf %0, %33 : vector<16x128xf32>
    %35 = arith.mulf %25, %34 : vector<16x128xf32>
    %36 = arith.addf %33, %35 : vector<16x128xf32>
    %c0_14 = arith.constant 0 : index
    %c0_15 = arith.constant 0 : index
    %37 = vector.load %arg7[%c0_14, %c0_15] : memref<16x128xf32, #tpu.memory_space<vmem>>, vector<16x128xf32>
    tpu.vector_store %arg7[%c0_14, %c0_15], %36 {strides = array<i32>} : memref<16x128xf32, #tpu.memory_space<vmem>>, vector<16x128xf32>,
    return
  }
  func.func @transform_0(%arg0: i32) -> (i32, i32) {
    %c0_i32 = arith.constant 0 : i32
    %c0_i32_0 = arith.constant 0 : i32
    return %arg0, %c0_i32 : i32, i32
  }
  func.func @transform_1(%arg0: i32) -> (i32, i32) {
    %c0_i32 = arith.constant 0 : i32
    %c0_i32_0 = arith.constant 0 : i32
    return %arg0, %c0_i32 : i32, i32
  }
  func.func @transform_2(%arg0: i32) -> (i32, i32) {
    %c0_i32 = arith.constant 0 : i32
    %c0_i32_0 = arith.constant 0 : i32
    %c0_i32_1 = arith.constant 0 : i32
    return %c0_i32, %c0_i32_0 : i32, i32
  }
  func.func @transform_3(%arg0: i32) -> (i32, i32) {
    %c0_i32 = arith.constant 0 : i32
    %c0_i32_0 = arith.constant 0 : i32
    %c0_i32_1 = arith.constant 0 : i32
    return %c0_i32, %c0_i32_0 : i32, i32
  }
  func.func @transform_4(%arg0: i32) -> (i32, i32) {
    %c0_i32 = arith.constant 0 : i32
    %c0_i32_0 = arith.constant 0 : i32
    %c0_i32_1 = arith.constant 0 : i32
    return %c0_i32, %c0_i32_0 : i32, i32
  }
  func.func @transform_5(%arg0: i32) -> (i32, i32) {
    %c0_i32 = arith.constant 0 : i32
    %c0_i32_0 = arith.constant 0 : i32
    %c0_i32_1 = arith.constant 0 : i32
    return %c0_i32, %c0_i32_0 : i32, i32
  }
  func.func @transform_6(%arg0: i32) -> (i32, i32) {
    %c0_i32 = arith.constant 0 : i32
    %c0_i32_0 = arith.constant 0 : i32
    return %arg0, %c0_i32 : i32, i32
  }
}

</mosaic_0001>

<bundles_post_ra>
// kernel: gru_forward.1
= control target key start
LH: loop header
LB: loop body
LE: loop exit
PB: predicated region body
PF: predicated region fallthrough
CT: control target
= control target key end

     0   :  { %11 = vsyncpa [#allocation3], 0  ;;  %s1051_s0 = inlined_call_operand.vmem [shape: bf16[16,128], index: 0, kind: input, shape index: {}]   ;;  %s1052_s1 = inlined_call_operand.vmem [shape: f32[16,128], index: 1, kind: input, shape index: {}]   ;;  %s1053_s2 = inlined_call_operand.hbm [shape: bf16[128,384], index: 2, kind: input, shape index: {}]   ;;  %s1054_s3 = inlined_call_operand.hbm [shape: bf16[128,384], index: 3, kind: input, shape index: {}]   ;;  %s1055_s4 = inlined_call_operand.vmem [shape: f32[1,384], index: 4, kind: input, shape index: {}]   ;;  %s1056_s5 = inlined_call_operand.vmem [shape: f32[1,128], index: 5, kind: input, shape index: {}]   ;;  %s1057_s6 = inlined_call_operand.hbm [shape: f32[16,128], index: 6, kind: output, shape index: {}]  }
   0x1   :  { %12 = vsyncpa [#allocation6], 0 }
   0x2   :  { %13 = vsyncpa [#allocation4], 0  ;;  %s925_s21 = smov [#allocation2]   ;;  %s853_s25 = scalar_lea.hbm %s1053_s2, 3072 }
   0x3   :  { %s23_s22 = sshll.u32 %s925_s21, 4  ;;  %p854_p0 = scmp.ne.s32.totalorder %s1053_s2, %s853_s25  ;;  %s24_s22 = int_to_ptr.vmem [resolvable:$true] %s23_s22 }
   0x4   :  { %p857_p1 = scmp.lt.u32.totalorder %s853_s25, %s1053_s2 }
   0x6   :  { %p859_p2 = pnand %p857_p1, %p854_p0 }
   0x8   :  { %862 = shalt.err (!%p859_p2)
}
   0x9   :  { %s863_s30 = scalar_lea.vmem %s24_s22, 3072  ;;  %p868_p4 = scmp.lt.s32.totalorder %s24_s22, %s24_s22 }
   0xa   :  { %p864_p3 = scmp.ne.s32.totalorder %s24_s22, %s863_s30  ;;  %p869_p5 = scmp.lt.s32.totalorder %s863_s30, %s863_s30 }
   0xc   :  { %p870_p6 = por %p869_p5, %p868_p4 }
   0xe   :  { %p871_p7 = pnand %p870_p6, %p864_p3 }
  0x10   :  { %874 = shalt.err (!%p871_p7)
}
  0x11   :  { %s926_s7 = smov 192   ;;  %s927_s8 = smov 12  }
  0x12   :  { %29 = dma.hbm_to_vmem [thread:$0]  %s1053_s2, 3072, %s24_s22, [#allocation3], %s926_s7, %s926_s7, %s927_s8  }
  0x13   :  { %s928_s11 = smov [#allocation5]   ;;  %s875_s15 = scalar_lea.hbm %s1054_s3, 3072 }
  0x14   :  { %s35_s12 = sshll.u32 %s928_s11, 4  ;;  %p876_p8 = scmp.ne.s32.totalorder %s1054_s3, %s875_s15  ;;  %s36_s12 = int_to_ptr.vmem [resolvable:$true] %s35_s12 }
  0x15   :  { %p879_p9 = scmp.lt.u32.totalorder %s875_s15, %s1054_s3 }
  0x17   :  { %p881_p10 = pnand %p879_p9, %p876_p8 }
  0x19   :  { %884 = shalt.err (!%p881_p10)
}
  0x1a   :  { %s885_s20 = scalar_lea.vmem %s36_s12, 3072  ;;  %p890_p12 = scmp.lt.s32.totalorder %s36_s12, %s36_s12 }
  0x1b   :  { %p886_p11 = scmp.ne.s32.totalorder %s36_s12, %s885_s20  ;;  %p891_p13 = scmp.lt.s32.totalorder %s885_s20, %s885_s20 }
  0x1d   :  { %p892_p0 = por %p891_p13, %p890_p12 }
  0x1f   :  { %p893_p1 = pnand %p892_p0, %p886_p11 }
  0x21   :  { %896 = shalt.err (!%p893_p1)
}
  0x22   :  { %41 = dma.hbm_to_vmem [thread:$0]  %s1054_s3, 3072, %s36_s12, [#allocation6], %s926_s7, %s926_s7, %s927_s8  }
  0x23   :  { %919 = dma.done.wait [#allocation3], 3072  }
  0x24   :  { %920 = vsyncadd [#allocation3], 4294964224 }
  0x25   :  { %921 = dma.done.wait [#allocation6], 3072  }
  0x26   :  { %922 = vsyncadd [#allocation6], 4294964224  ;;  %v929_v0 = vmov 0.0   ;;  %v930_v1 = vmov 0   ;;  %vm931_vm0 = vmmov 0   ;;  %v798_v26 = vld [vmem:[%s1051_s0] sm:$0xff]   ;;  %v91_v58 = vlaneseq }
  0x27   :  { %710 = vmatprep.subr.bf16.mxu1 %v929_v0  ;;  %272 = vmatprep.mubr.bf16.mxu0 %v930_v1  ;;  %v768_v2 = vld [vmem:[#allocation2 + $0x4] ss:$12 sps:$4 sm:$0xff]   ;;  %v770_v3 = vld [vmem:[#allocation2] ss:$12 sps:$4 sm:$0xff]   ;;  %v771_v4 = vld [vmem:[#allocation2 + $0x1c] ss:$12 sps:$4 sm:$0xff]  }
  0x28   :  { %726 = vmatprep.mubr.msk.bf16.mxu1 %vm931_vm0, %v929_v0  ;;  %240 = vmatprep.subr.bf16.mxu0 %v768_v2  ;;  %v773_v5 = vld [vmem:[#allocation2 + $0x18] ss:$12 sps:$4 sm:$0xff]   ;;  %v774_v6 = vld [vmem:[#allocation2 + $0x34] ss:$12 sps:$4 sm:$0xff]   ;;  %v776_v7 = vld [vmem:[#allocation2 + $0x30] ss:$12 sps:$4 sm:$0xff]  }
  0x29   :  { %241 = vmatpush1.bf16.msra.mxu0 %v770_v3  ;;  %v777_v8 = vld [vmem:[#allocation2 + $0x4c] ss:$12 sps:$4 sm:$0xff]   ;;  %v788_v9 = vld [vmem:[#allocation2 + $0x8] ss:$12 sps:$4 sm:$0xff]   ;;  %v780_v11 = vld [vmem:[#allocation2 + $0x64] ss:$12 sps:$4 sm:$0xff]  }
  0x2a   :  { %242 = vmatprep.subr.bf16.mxu0 %v771_v4  ;;  %v779_v10 = vld [vmem:[#allocation2 + $0x48] ss:$12 sps:$4 sm:$0xff]   ;;  %711 = vmatpush3.bf16.msra.mxu1 %v788_v9  ;;  %v792_v12 = vld [vmem:[#allocation2 + $0x20] ss:$12 sps:$4 sm:$0xff]   ;;  %v794_v14 = vld [vmem:[#allocation2 + $0x38] ss:$12 sps:$4 sm:$0xff]  }
  0x2b   :  { %712 = vmatprep.subr.bf16.mxu1 %v929_v0  ;;  %v782_v13 = vld [vmem:[#allocation2 + $0x60] ss:$12 sps:$4 sm:$0xff]   ;;  %v783_v15 = vld [vmem:[#allocation2 + $0x7c] ss:$12 sps:$4 sm:$0xff]   ;;  %v785_v16 = vld [vmem:[#allocation2 + $0x78] ss:$12 sps:$4 sm:$0xff]  }
  0x2c   :  { %v799_v17 = vld [vmem:[#allocation2 + $0x50] ss:$12 sps:$4 sm:$0xff]   ;;  %v786_v18 = vld [vmem:[#allocation2 + $0x94] ss:$12 sps:$4 sm:$0xff]   ;;  %v790_v21 = vld [vmem:[#allocation2 + $0xac] ss:$12 sps:$4 sm:$0xff]  }
  0x2d   :  { %243 = vmatpush1.bf16.msra.mxu0 %v773_v5  ;;  %v789_v19 = vld [vmem:[#allocation2 + $0x90] ss:$12 sps:$4 sm:$0xff]   ;;  %v803_v20 = vld [vmem:[#allocation2 + $0x68] ss:$12 sps:$4 sm:$0xff]   ;;  %v807_v23 = vld [vmem:[#allocation2 + $0x80] ss:$12 sps:$4 sm:$0xff]  }
  0x2e   :  { %244 = vmatprep.subr.bf16.mxu0 %v774_v6  ;;  %713 = vmatpush3.bf16.msra.mxu1 %v792_v12  ;;  %v793_v22 = vld [vmem:[#allocation2 + $0xa8] ss:$12 sps:$4 sm:$0xff]   ;;  %v797_v24 = vld [vmem:[#allocation5 + $0x4] ss:$12 sps:$4 sm:$0xff]   ;;  %v795_v25 = vld [vmem:[#allocation5] ss:$12 sps:$4 sm:$0xff]  }
  0x2f   :  { %714 = vmatprep.subr.bf16.mxu1 %v929_v0  ;;  %v811_v27 = vld [vmem:[#allocation2 + $0x98] ss:$12 sps:$4 sm:$0xff]   ;;  %v802_v28 = vld [vmem:[#allocation5 + $0x1c] ss:$12 sps:$4 sm:$0xff]   ;;  %v806_v31 = vld [vmem:[#allocation5 + $0x34] ss:$12 sps:$4 sm:$0xff]  }
  0x30   :  { %v800_v29 = vld [vmem:[#allocation5 + $0x18] ss:$12 sps:$4 sm:$0xff]   ;;  %v815_v30 = vld [vmem:[#allocation2 + $0xb0] ss:$12 sps:$4 sm:$0xff]   ;;  %v822_v33 = vld [vmem:[#allocation5 + $0x8] ss:$12 sps:$4 sm:$0xff]  }
  0x31   :  { %245 = vmatpush1.bf16.msra.mxu0 %v776_v7  ;;  %v804_v32 = vld [vmem:[#allocation5 + $0x30] ss:$12 sps:$4 sm:$0xff]   ;;  %v810_v34 = vld [vmem:[#allocation5 + $0x4c] ss:$12 sps:$4 sm:$0xff]   ;;  %v808_v35 = vld [vmem:[#allocation5 + $0x48] ss:$12 sps:$4 sm:$0xff]  }
  0x32   :  { %246 = vmatprep.subr.bf16.mxu0 %v777_v8  ;;  %715 = vmatpush3.bf16.msra.mxu1 %v794_v14  ;;  %v826_v36 = vld [vmem:[#allocation5 + $0x20] ss:$12 sps:$4 sm:$0xff]   ;;  %v814_v37 = vld [vmem:[#allocation5 + $0x64] ss:$12 sps:$4 sm:$0xff]   ;;  %v818_v40 = vld [vmem:[#allocation5 + $0x7c] ss:$12 sps:$4 sm:$0xff]  }
  0x33   :  { %716 = vmatprep.subr.bf16.mxu1 %v929_v0  ;;  %v812_v38 = vld [vmem:[#allocation5 + $0x60] ss:$12 sps:$4 sm:$0xff]   ;;  %v827_v39 = vld [vmem:[#allocation5 + $0x38] ss:$12 sps:$4 sm:$0xff]   ;;  %v828_v42 = vld [vmem:[#allocation5 + $0x50] ss:$12 sps:$4 sm:$0xff]  }
  0x34   :  { %v816_v41 = vld [vmem:[#allocation5 + $0x78] ss:$12 sps:$4 sm:$0xff]   ;;  %v821_v43 = vld [vmem:[#allocation5 + $0x94] ss:$12 sps:$4 sm:$0xff]   ;;  %v819_v44 = vld [vmem:[#allocation5 + $0x90] ss:$12 sps:$4 sm:$0xff]  }
  0x35   :  { %247 = vmatpush1.bf16.msra.mxu0 %v779_v10  ;;  %v829_v45 = vld [vmem:[#allocation5 + $0x68] ss:$12 sps:$4 sm:$0xff]   ;;  %v825_v46 = vld [vmem:[#allocation5 + $0xac] ss:$12 sps:$4 sm:$0xff]   ;;  %v1024_v49 = vld [vmem:[%s1052_s1 + $0x8] sm:$0xff]  ;;  %v92_v59 = vshrl.u32 %v91_v58, 7 }
  0x36   :  { %248 = vmatprep.subr.bf16.mxu0 %v780_v11  ;;  %717 = vmatpush3.bf16.msra.mxu1 %v799_v17  ;;  %v823_v47 = vld [vmem:[#allocation5 + $0xa8] ss:$12 sps:$4 sm:$0xff]   ;;  %v1019_v48 = vld [vmem:[%s1052_s1] sm:$0xff]  ;;  %v830_v50 = vld [vmem:[#allocation5 + $0x80] ss:$12 sps:$4 sm:$0xff]  }
  0x37   :  { %718 = vmatprep.subr.bf16.mxu1 %v929_v0  ;;  %v324_v51 = vpack.c.bf16 %v1024_v49, %v1019_v48  ;;  %v831_v52 = vld [vmem:[#allocation5 + $0x98] ss:$12 sps:$4 sm:$0xff]   ;;  %v832_v53 = vld [vmem:[#allocation5 + $0xb0] ss:$12 sps:$4 sm:$0xff]   ;;  %v93_v60 = vsub.s32 0, %v92_v59  ;;  %v97_v2 = vsub.s32 1, %v92_v59 }
  0x38   :  { %v89_v61 = vld [vmem:[%s1055_s4] sm:$0x7] }
  0x39   :  { %249 = vmatpush1.bf16.msra.mxu0 %v782_v13  ;;  %v94_v62 = vrot.slane %v89_v61, %v93_v60  ;;  %v98_v7 = vrot.slane %v89_v61, %v97_v2 }
  0x3a   :  { %250 = vmatprep.subr.bf16.mxu0 %v783_v15  ;;  %719 = vmatpush3.bf16.msra.mxu1 %v803_v20 }
  0x3b   :  { %720 = vmatprep.subr.bf16.mxu1 %v929_v0 }
  0x3d   :  { %251 = vmatpush1.bf16.msra.mxu0 %v785_v16 }
  0x3e   :  { %252 = vmatprep.subr.bf16.mxu0 %v786_v18  ;;  %721 = vmatpush3.bf16.msra.mxu1 %v807_v23 }
  0x3f   :  { %722 = vmatprep.subr.bf16.mxu1 %v929_v0 }
  0x41   :  { %253 = vmatpush1.bf16.msra.mxu0 %v789_v19 }
  0x42   :  { %254 = vmatprep.subr.bf16.mxu0 %v790_v21  ;;  %723 = vmatpush3.bf16.msra.mxu1 %v811_v27  ;;  %v101_v21 = vsub.s32 2, %v92_v59 }
  0x43   :  { %724 = vmatprep.subr.bf16.mxu1 %v929_v0 }
  0x44   :  { %v102_v23 = vrot.slane %v89_v61, %v101_v21 }
  0x45   :  { %255 = vmatpush1.bf16.msra.mxu0 %v793_v22  ;;  %v691_v22 = vld [vmem:[%s1056_s5] ss:$0 sm:$0xff]  ;;  %s932_s5 = smov [#allocation7]  }
  0x46   :  { %485 = vmatprep.subr.bf16.mxu0 %v797_v24  ;;  %725 = vmatpush3.bf16.msra.mxu1 %v815_v30  ;;  %s625_s28 = sshll.u32 %s932_s5, 4  ;;  %s626_s28 = int_to_ptr.vmem [resolvable:$true] %s625_s28 }
  0x47   :  { %730 = vmatprep.subr.bf16.mxu1 %v929_v0  ;;  %s897_s29 = scalar_lea.vmem %s626_s28, 256  ;;  %p902_p3 = scmp.lt.s32.totalorder %s626_s28, %s626_s28 }
  0x48   :  { %273 = vmatmul.mubr.bf16.vlgmr.msra.gmra.mrb[0].mxu0 %v798_v26  ;;  %p898_p2 = scmp.ne.s32.totalorder %s626_s28, %s897_s29  ;;  %p903_p4 = scmp.lt.s32.totalorder %s897_s29, %s897_s29 }
  0x49   :  { %486 = vmatpush1.bf16.msra.mxu0 %v795_v25  ;;  %517 = vmatprep.mubr.bf16.mxu0 %v930_v1 }
  0x4a   :  { %487 = vmatprep.subr.bf16.mxu0 %v802_v28  ;;  %727 = vmatmul.mubr.bf16.vlgmr.msra.gmra.mrb[0].mxu1 %v798_v26  ;;  %p904_p5 = por %p903_p4, %p902_p3 }
  0x4b   :  { %731 = vmatpush3.bf16.msra.mxu1 %v822_v33  ;;  %746 = vmatprep.mubr.msk.bf16.mxu1 %vm931_vm0, %v929_v0 }
  0x4c   :  { %732 = vmatprep.subr.bf16.mxu1 %v929_v0  ;;  %p905_p6 = pnand %p904_p5, %p898_p2 }
  0x4d   :  { %488 = vmatpush1.bf16.msra.mxu0 %v800_v29 }
  0x4e   :  { %489 = vmatprep.subr.bf16.mxu0 %v806_v31 }
  0x4f   :  { %733 = vmatpush3.bf16.msra.mxu1 %v826_v36 }
  0x50   :  { %734 = vmatprep.subr.bf16.mxu1 %v929_v0 }
  0x51   :  { %490 = vmatpush1.bf16.msra.mxu0 %v804_v32 }
  0x52   :  { %491 = vmatprep.subr.bf16.mxu0 %v810_v34 }
  0x53   :  { %735 = vmatpush3.bf16.msra.mxu1 %v827_v39 }
  0x54   :  { %736 = vmatprep.subr.bf16.mxu1 %v929_v0 }
  0x55   :  { %492 = vmatpush1.bf16.msra.mxu0 %v808_v35 }
  0x56   :  { %493 = vmatprep.subr.bf16.mxu0 %v814_v37 }
  0x57   :  { %737 = vmatpush3.bf16.msra.mxu1 %v828_v42 }
  0x58   :  { %738 = vmatprep.subr.bf16.mxu1 %v929_v0 }
  0x59   :  { %494 = vmatpush1.bf16.msra.mxu0 %v812_v38 }
  0x5a   :  { %495 = vmatprep.subr.bf16.mxu0 %v818_v40 }
  0x5b   :  { %739 = vmatpush3.bf16.msra.mxu1 %v829_v45 }
  0x5c   :  { %740 = vmatprep.subr.bf16.mxu1 %v929_v0 }
  0x5d   :  { %496 = vmatpush1.bf16.msra.mxu0 %v816_v41 }
  0x5e   :  { %497 = vmatprep.subr.bf16.mxu0 %v821_v43 }
  0x5f   :  { %741 = vmatpush3.bf16.msra.mxu1 %v830_v50 }
  0x60   :  { %742 = vmatprep.subr.bf16.mxu1 %v929_v0 }
  0x61   :  { %498 = vmatpush1.bf16.msra.mxu0 %v819_v44 }
  0x62   :  { %499 = vmatprep.subr.bf16.mxu0 %v825_v46 }
  0x63   :  { %743 = vmatpush3.bf16.msra.mxu1 %v831_v52 }
  0x64   :  { %744 = vmatprep.subr.bf16.mxu1 %v929_v0 }
  0x65   :  { %500 = vmatpush1.bf16.msra.mxu0 %v823_v47 }
  0x67   :  { %745 = vmatpush3.bf16.msra.mxu1 %v832_v53 }
  0x68   :  { %518 = vmatmul.mubr.bf16.vlgmr.msra.gmra.mrb[0].mxu0 %v324_v51 }
  0x6a   :  { %747 = vmatmul.mubr.bf16.vlgmr.msra.gmra.mrb[4].mxu1 %v324_v51 }
 0x11d   :  { %v317_v54 = vpop.f32.mrb[0].mxu1 }
 0x11e   :  { %v728_v55 = vpop.f32.mrb[1].mxu1  ;;  %v318_v28 = vadd.f32 %v317_v54, %v102_v23 }
 0x11f   :  { %v320_v56 = vpop.f32.mrb[2].mxu1 }
 0x120   :  { %v729_v57 = vpop.f32.mrb[3].mxu1  ;;  %v321_v33 = vadd.f32 %v320_v56, %v102_v23 }
 0x13b   :  { %v519_v63 = vpop.f32.mrb[0].mxu0 }
 0x13c   :  { %v750_v1 = vadd.f32 %v519_v63, %v94_v62  ;;  %v521_v3 = vpop.f32.mrb[1].mxu0 }
 0x13d   :  { %v523_v4 = vpop.f32.mrb[2].mxu0  ;;  %v562_v9 = vpop.f32.mrb[4].mxu1  ;;  %v751_v10 = vadd.f32 %v521_v3, %v98_v7 }
 0x13e   :  { %v687_v0 = vmul.f32 -1.442695, %v750_v1  ;;  %v752_v5 = vadd.f32 %v523_v4, %v94_v62  ;;  %v525_v6 = vpop.f32.mrb[3].mxu0  ;;  %v748_v11 = vpop.f32.mrb[5].mxu1  ;;  %v604_v24 = vadd.f32 %v691_v22, %v562_v9 }
 0x13f   :  { %v565_v12 = vpop.f32.mrb[6].mxu1  ;;  %v753_v13 = vadd.f32 %v525_v6, %v98_v7  ;;  %v689_v15 = vmul.f32 -1.442695, %v751_v10 }
 0x140   :  { %833 = vpow2.f32 %v687_v0  ;;  %v688_v8 = vmul.f32 -1.442695, %v752_v5  ;;  %v749_v14 = vpop.f32.mrb[7].mxu1  ;;  %v605_v30 = vadd.f32 %v691_v22, %v565_v12 }
 0x141   :  { %v690_v17 = vmul.f32 -1.442695, %v753_v13 }
 0x142   :  { %835 = vpow2.f32 %v688_v8 }
 0x143   :  { %837 = vpow2.f32 %v689_v15 }
 0x14a   :  { %v834_v16 = vpop.eup %833 }
 0x14b   :  { %v577_v18 = vadd.f32 1.0, %v834_v16 }
 0x14c   :  { %v836_v19 = vpop.eup %835 }
 0x14d   :  { %839 = vrcp.f32 %v577_v18  ;;  %v578_v20 = vadd.f32 1.0, %v836_v19  ;;  %v838_v25 = vpop.eup %837 }
 0x14e   :  { %841 = vpow2.f32 %v690_v17  ;;  %v591_v32 = vadd.f32 1.0, %v838_v25 }
 0x14f   :  { %843 = vrcp.f32 %v578_v20 }
 0x157   :  { %v840_v26 = vpop.eup %839 }
 0x158   :  { %v842_v27 = vpop.eup %841  ;;  %v606_v29 = vmul.f32 %v840_v26, %v604_v24 }
 0x159   :  { %v844_v31 = vpop.eup %843  ;;  %v592_v36 = vadd.f32 1.0, %v842_v27 }
 0x15a   :  { %v608_v34 = vadd.f32 %v606_v29, %v318_v28  ;;  %v607_v35 = vmul.f32 %v844_v31, %v605_v30 }
 0x15c   :  { %845 = vtanh.f32 %v608_v34  ;;  %v609_v37 = vadd.f32 %v607_v35, %v321_v33 }
 0x15d   :  { %847 = vrcp.f32 %v591_v32 }
 0x15e   :  { %849 = vtanh.f32 %v609_v37 }
 0x15f   :  { %851 = vrcp.f32 %v592_v36 }
 0x166   :  { %v846_v38 = vpop.eup %845 }
 0x167   :  { %v848_v39 = vpop.eup %847  ;;  %v612_v40 = vsub.f32 %v1019_v48, %v846_v38 }
 0x168   :  { %v850_v41 = vpop.eup %849 }
 0x169   :  { %v613_v42 = vsub.f32 %v1024_v49, %v850_v41  ;;  %v614_v43 = vmul.f32 %v848_v39, %v612_v40  ;;  %v852_v44 = vpop.eup %851 }
 0x16b   :  { %v615_v45 = vmul.f32 %v852_v44, %v613_v42  ;;  %v616_v46 = vadd.f32 %v846_v38, %v614_v43 }
 0x16d   :  { %v617_v47 = vadd.f32 %v850_v41, %v615_v45  ;;  %618 = vst [vmem:[#allocation7] sm:$0xff] %v616_v46 }
 0x16f   :  { %619 = vst [vmem:[#allocation7 + $0x8] sm:$0xff] %v617_v47 }
 0x170   :  { %908 = shalt.err (!%p905_p6)
}
 0x171   :  { %s909_s8 = scalar_lea.hbm %s1057_s6, 256 }
 0x172   :  { %p910_p7 = scmp.ne.s32.totalorder %s1057_s6, %s909_s8  ;;  %p913_p8 = scmp.lt.u32.totalorder %s909_s8, %s1057_s6 }
 0x174   :  { %p915_p9 = pnand %p913_p8, %p910_p7 }
 0x176   :  { %918 = shalt.err (!%p915_p9)
}
 0x177   :  { %s933_s13 = smov 128   ;;  %s934_s14 = smov 8  }
 0x178   :  { %631 = dma.vmem_to_hbm [thread:$0]  %s626_s28, 256, %s1057_s6, [#allocation4], %s933_s13, %s933_s13, %s934_s14  }
 0x179   :  { %923 = dma.done.wait [#allocation4], 256  }
 0x17a   :  { %924 = vsyncadd [#allocation4], 4294967040 }
 0x17b   :  { %635 = vsyncpa [#allocation3], 1 }
 0x17c   :  { %636 = vsyncpa [#allocation6], 1 }
 0x17d   :  { %637 = vsyncpa [#allocation4], 1 }

</bundles_post_ra>
